<compile_context>
chip_gen: v5e
topology: v5e:2x2
jax: 0.10.0
libtpu: 0.0.40
codegen_flags: <defaults>
</compile_context>

<pallas_src>
import functools

import jax
import jax.numpy as jnp
from jax import lax
from jax.experimental import pallas as pl
from jax.experimental.pallas import tpu as pltpu

LANES = 128
SUBLANES = 8
# f32: 8192*128*4B = 4 MiB per block (bf16: 2 MiB); 2x with double-buffering.
# Safe on v5e/v6e/v7x scoped-VMEM defaults and large enough per step to stay
# near the HBM roofline even at v7x bandwidth.  Multiple of 16 for bf16 tiles.
BLOCK_ROWS = 8192


def _range_loss_kernel(x_ref, o_ref, acc_ref, *, lo, hi, rows, block_rows,
                       ragged, inv_n):
    i = pl.program_id(0)

    @pl.when(i == 0)
    def _():
        acc_ref[...] = jnp.zeros_like(acc_ref)

    x = x_ref[...].astype(jnp.float32)
    # Amount by which x leaves [lo, hi]:  max(x - hi, lo - x, 0).
    excess = jnp.maximum(jnp.maximum(x - hi, lo - x), 0.0)

    def _accum(e):
        if block_rows % SUBLANES == 0:
            # (T,128) -> (T/8, 8, 128); sum over axis 0 = pure VPU vreg adds
            # into the resident (8,128) accumulator.  No per-step XLU reduce.
            acc_ref[...] += e.reshape(-1, SUBLANES, LANES).sum(axis=0)
        else:
            # Small single-block fast path (block == full slab, rows < 8).
            acc_ref[0:1, :] += e.sum(axis=0, keepdims=True)

    if ragged:
        last = pl.num_programs(0) - 1

        @pl.when(i != last)
        def _():
            _accum(excess)

        @pl.when(i == last)
        def _():
            # The last block overhangs the array; OOB rows hold unspecified
            # data, so mask them to 0 before accumulating.
            row_ids = lax.broadcasted_iota(jnp.int32, excess.shape, 0)
            valid = row_ids < (rows - i * block_rows)
            _accum(jnp.where(valid, excess, 0.0))
    else:
        _accum(excess)

    @pl.when(i == pl.num_programs(0) - 1)
    def _():
        # One-time cross-lane/sublane reduce, scale by 1/N (the mean).
        o_ref[...] = (jnp.sum(acc_ref[...]) * jnp.float32(inv_n)).reshape(1, 1)


def range_loss(x, legit_range=(0.0, 1.0), chroma_mode=False):
    """Pallas equivalent of RangeLoss.forward (chroma_mode=False)."""
    if chroma_mode:
        # TODO(synk): ycbcr_to_rgb color conversion is not defined in the
        # reference module; only chroma_mode=False is implemented.
        raise NotImplementedError("chroma_mode=True is not supported")

    lo, hi = float(legit_range[0]), float(legit_range[1])
    total = x.size
    inv_n = 1.0 / total

    xf = x.reshape(-1)                      # keep original dtype in HBM
    pad = (-total) % LANES
    if pad:
        # Rare (numel not a multiple of 128): pad <128 elements with an
        # in-range value so the padding contributes exactly 0 to the sum.
        xf = jnp.pad(xf, (0, pad), constant_values=jnp.asarray(lo, x.dtype))
    rows = xf.shape[0] // LANES
    x2 = xf.reshape(rows, LANES)            # lane-dense slab view

    if rows <= BLOCK_ROWS:
        block_rows = rows                   # full-dim block: always legal
        grid = (1,)
        ragged = False
    else:
        block_rows = BLOCK_ROWS
        grid = (pl.cdiv(rows, BLOCK_ROWS),)
        ragged = (rows % BLOCK_ROWS) != 0

    kernel = functools.partial(
        _range_loss_kernel, lo=lo, hi=hi, rows=rows, block_rows=block_rows,
        ragged=ragged, inv_n=inv_n)

    out = pl.pallas_call(
        kernel,
        out_shape=jax.ShapeDtypeStruct((1, 1), jnp.float32),
        grid_spec=pltpu.PrefetchScalarGridSpec(
            num_scalar_prefetch=0,
            grid=grid,
            in_specs=[pl.BlockSpec((block_rows, LANES), lambda i: (i, 0))],
            out_specs=pl.BlockSpec((1, 1), lambda i: (0, 0)),
            scratch_shapes=[pltpu.VMEM((SUBLANES, LANES), jnp.float32)],
        ),
        compiler_params=pltpu.CompilerParams(
            dimension_semantics=("arbitrary",)),
    )(x2)

    return out[0, 0]


def _range_loss_ref(x, lo=0.0, hi=1.0):
    xf = x.astype(jnp.float32)
    return jnp.mean(jnp.maximum(jnp.maximum(xf - hi, lo - xf), 0.0))


if __name__ == "__main__":
    key = jax.random.PRNGKey(0)
    k0, k1 = jax.random.split(key)

    # Small NCHW case, as the module's forward implies (image batch).
    x_small = jax.random.normal(k0, (2, 4, 16, 16), dtype=jnp.float32)
    loss_small = range_loss(x_small)
    jax.block_until_ready(loss_small)
    ref_small = _range_loss_ref(x_small)
    assert jnp.allclose(loss_small, ref_small, rtol=1e-5, atol=1e-6), (
        loss_small, ref_small)

    # Multi-block + ragged-tail path (exercises the in-kernel row mask).
    x_big = jax.random.normal(k1, (2, 3, 700, 384), dtype=jnp.float32) * 2.0
    loss_big = range_loss(x_big)
    jax.block_until_ready(loss_big)
    ref_big = _range_loss_ref(x_big)
    assert jnp.allclose(loss_big, ref_big, rtol=1e-4, atol=1e-5), (
        loss_big, ref_big)

    print("KERNEL_OK")
</pallas_src>

<mosaic_0001>
module attributes {stable_mosaic.version = 11 : i64} {
  func.func @_range_loss_kernel(%arg0: i32, %arg1: memref<16x128xf32, #tpu.memory_space<vmem>>, %arg2: memref<1x1xf32, #tpu.memory_space<vmem>>, %arg3: memref<8x128xf32, #tpu.memory_space<vmem>>) attributes {dimension_semantics = [#tpu.dimension_semantics<arbitrary>], iteration_bounds = array<i64: 1>, scalar_prefetch = 0 : i64, scratch_operands = 1 : i64, tpu.core_type = #tpu.core_type<tc>, window_params = [{transform_indices = @transform_0, window_bounds = array<i64: 16, 128>}, {pipeline_mode = #tpu.pipeline_mode<synchronous>, transform_indices = @transform_1, window_bounds = array<i64: 1, 1>}]} {
    %c0_i32 = arith.constant 0 : i32
    %0 = arith.cmpi eq, %arg0, %c0_i32 : i32
    %1 = arith.extui %0 : i1 to i32
    %c0_i32_0 = arith.constant 0 : i32
    %2 = arith.cmpi ne, %1, %c0_i32_0 : i32
    scf.if %2 {
      %cst_11 = arith.constant 0.000000e+00 : f32
      %19 = vector.broadcast %cst_11 : f32 to vector<8x128xf32>
      %c0_12 = arith.constant 0 : index
      %c0_13 = arith.constant 0 : index
      %20 = vector.load %arg3[%c0_12, %c0_13] : memref<8x128xf32, #tpu.memory_space<vmem>>, vector<8x128xf32>
      tpu.vector_store %arg3[%c0_12, %c0_13], %19 {strides = array<i32>} : memref<8x128xf32, #tpu.memory_space<vmem>>, vector<8x128xf32>,
    } else {
    }
    %c0 = arith.constant 0 : index
    %c0_1 = arith.constant 0 : index
    %3 = vector.load %arg1[%c0, %c0_1] : memref<16x128xf32, #tpu.memory_space<vmem>>, vector<16x128xf32>
    %cst = arith.constant 1.000000e+00 : f32
    %4 = vector.broadcast %cst : f32 to vector<16x128xf32>
    %5 = arith.subf %3, %4 : vector<16x128xf32>
    %cst_2 = arith.constant 0.000000e+00 : f32
    %6 = vector.broadcast %cst_2 : f32 to vector<16x128xf32>
    %7 = arith.subf %6, %3 : vector<16x128xf32>
    %8 = arith.maximumf %5, %7 : vector<16x128xf32>
    %cst_3 = arith.constant 0.000000e+00 : f32
    %9 = vector.broadcast %cst_3 : f32 to vector<16x128xf32>
    %10 = arith.maximumf %8, %9 : vector<16x128xf32>
    %c0_4 = arith.constant 0 : index
    %c0_5 = arith.constant 0 : index
    %11 = vector.load %arg3[%c0_4, %c0_5] : memref<8x128xf32, #tpu.memory_space<vmem>>, vector<8x128xf32>
    %12 = vector.shape_cast %10 : vector<16x128xf32> to vector<2x8x128xf32>
    %cst_6 = arith.constant dense<0.000000e+00> : vector<8x128xf32>
    %13 = vector.multi_reduction <add>, %12, %cst_6 [0] : vector<2x8x128xf32> to vector<8x128xf32>
    %14 = arith.addf %11, %13 : vector<8x128xf32>
    %c0_7 = arith.constant 0 : index
    %c0_8 = arith.constant 0 : index
    %15 = vector.load %arg3[%c0_7, %c0_8] : memref<8x128xf32, #tpu.memory_space<vmem>>, vector<8x128xf32>
    tpu.vector_store %arg3[%c0_7, %c0_8], %14 {strides = array<i32>} : memref<8x128xf32, #tpu.memory_space<vmem>>, vector<8x128xf32>,
    %c0_i32_9 = arith.constant 0 : i32
    %16 = arith.cmpi eq, %arg0, %c0_i32_9 : i32
    %17 = arith.extui %16 : i1 to i32
    %c0_i32_10 = arith.constant 0 : i32
    %18 = arith.cmpi ne, %17, %c0_i32_10 : i32
    scf.if %18 {
      %c0_11 = arith.constant 0 : index
      %c0_12 = arith.constant 0 : index
      %19 = vector.load %arg3[%c0_11, %c0_12] : memref<8x128xf32, #tpu.memory_space<vmem>>, vector<8x128xf32>
      %20 = vector.shape_cast %19 : vector<8x128xf32> to vector<1x8x128xf32>
      %cst_13 = arith.constant dense<0.000000e+00> : vector<1xf32>
      %21 = vector.multi_reduction <add>, %20, %cst_13 [1, 2] : vector<1x8x128xf32> to vector<1xf32>
      %22 = vector.shape_cast %21 : vector<1xf32> to vector<1x1x1xf32>
      %23 = vector.extract %22[0, 0, 0] : f32 from vector<1x1x1xf32>
      %cst_14 = arith.constant 4.8828125E-4 : f32
      %24 = arith.mulf %23, %cst_14 : f32
      %25 = vector.broadcast %24 : f32 to vector<1x1xf32>
      %c0_15 = arith.constant 0 : index
      %c0_16 = arith.constant 0 : index
      %26 = vector.load %arg2[%c0_15, %c0_16] : memref<1x1xf32, #tpu.memory_space<vmem>>, vector<1x1xf32>
      tpu.vector_store %arg2[%c0_15, %c0_16], %25 {strides = array<i32>} : memref<1x1xf32, #tpu.memory_space<vmem>>, vector<1x1xf32>,
    } else {
    }
    return
  }
  func.func @transform_0(%arg0: i32) -> (i32, i32) {
    %c0_i32 = arith.constant 0 : i32
    %c0_i32_0 = arith.constant 0 : i32
    return %arg0, %c0_i32 : i32, i32
  }
  func.func @transform_1(%arg0: i32) -> (i32, i32) {
    %c0_i32 = arith.constant 0 : i32
    %c0_i32_0 = arith.constant 0 : i32
    %c0_i32_1 = arith.constant 0 : i32
    return %c0_i32, %c0_i32_0 : i32, i32
  }
}

</mosaic_0001>

<bundles_post_ra>
// kernel: tpu_custom_call.1
= control target key start
LH: loop header
LB: loop body
LE: loop exit
PB: predicated region body
PF: predicated region fallthrough
CT: control target
= control target key end

     0   :  { %6 = vsyncpa [#allocation4], 0  ;;  %s158_s0 = inlined_call_operand.hbm [shape: f32[16,128], index: 0, kind: input, shape index: {}]   ;;  %s159_s1 = inlined_call_operand.hbm [shape: f32[1,1], index: 1, kind: output, shape index: {}]  }
   0x1   :  { %7 = vsyncpa [#allocation5], 0  ;;  %s12_s8 = sshll.u32 %s158_s0, 4  ;;  %s138_s9 = smov [#allocation3]   ;;  %s13_s8 = int_to_ptr.hbm [resolvable:$true] %s12_s8 }
   0x2   :  { %s14_s10 = sshll.u32 %s138_s9, 4  ;;  %s139_s11 = smov 128   ;;  %s15_s10 = int_to_ptr.vmem [resolvable:$true] %s14_s10 }
   0x3   :  { %s140_s12 = smov 8  }
   0x4   :  { %20 = dma.hbm_to_vmem [thread:$0]  %s13_s8, 256, %s15_s10, [#allocation4], %s139_s11, %s139_s11, %s140_s12  }
   0x5   :  { %134 = dma.done.wait [#allocation4], 256  }
   0x6   :  { %135 = vsyncadd [#allocation4], 4294967040  ;;  %v30_v0 = vld [vmem:[#allocation3] sm:$0xff]  ;;  %v31_v1 = vld [vmem:[#allocation3 + $0x8] sm:$0xff]  ;;  %s141_s0 = smov [#allocation6]   ;;  %s68_s16 = sshll.u32 %s159_s1, 4  ;;  %s69_s16 = int_to_ptr.hbm [resolvable:$true] %s68_s16 }
   0x7   :  { %v78_v2 = vadd.f32 -1.0, %v30_v0  ;;  %v79_v3 = vadd.f32 -1.0, %v31_v1  ;;  %v34_v4 = vsub.f32 0.0, %v30_v0  ;;  %v35_v5 = vsub.f32 0.0, %v31_v1  ;;  %s66_s13 = sshll.u32 %s141_s0, 4  ;;  %s67_s13 = int_to_ptr.vmem [resolvable:$true] %s66_s13 }
   0x8   :  { %vm59_vm0 = vcmask 0  }
   0x9   :  { %v36_v6 = vmax.f32 %v78_v2, %v34_v4  ;;  %v37_v7 = vmax.f32 %v79_v3, %v35_v5 }
   0xb   :  { %v38_v8 = vmax.f32 %v36_v6, 0.0  ;;  %v39_v9 = vmax.f32 %v37_v7, 0.0 }
   0xd   :  { %v41_v10 = vadd.f32 %v39_v9, %v38_v8 }
   0xf   :  { %48 = vadd.xlane.f32.xlu0 %v41_v10 }
  0x82   :  { %v49_v11 = vpop.xlane.xlu0 %48 }
  0x83   :  { %v50_v12 = vrot.slane %v49_v11, 4 }
  0x85   :  { %v51_v13 = vadd.f32 %v50_v12, %v49_v11 }
  0x87   :  { %v52_v14 = vrot.slane %v51_v13, 2 }
  0x89   :  { %v53_v15 = vadd.f32 %v52_v14, %v51_v13 }
  0x8b   :  { %v54_v16 = vrot.slane %v53_v15, 1 }
  0x8d   :  { %v55_v17 = vadd.f32 %v54_v16, %v53_v15 }
  0x8f   :  { %80 = vpush %v55_v17 }
  0xc0   :  { %s81_s17 = spop %80 }
  0xc1   :  { %s57_s18 = smul.f32 0.00048828125, %s81_s17 }
  0xc3   :  { %v58_v18 = vstv %s57_s18 }
  0xc4   :  { %60 = vst.msk [vmem:[#allocation6] sm:$0x1] %vm59_vm0, %v58_v18 }
  0xc5   :  { %71 = dma.vmem_to_hbm [thread:$0]  %s67_s13, 16, %s69_s16, [#allocation5]  }
  0xc6   :  { %136 = dma.done.wait [#allocation5], 16  }
  0xc7   :  { %137 = vsyncadd [#allocation5], 4294967280 }
  0xc8   :  { %76 = vsyncpa [#allocation4], 1 }
  0xc9   :  { %77 = vsyncpa [#allocation5], 1 }

</bundles_post_ra>
